<compile_context>
chip_gen: v7x
topology: tpu7x:2x2x1
jax: 0.10.0
libtpu: 0.0.40
codegen_flags: <defaults>
</compile_context>

<pallas_src>
import jax
import jax.numpy as jnp
from jax.experimental import pallas as pl
from jax.experimental.pallas import tpu as pltpu


# -----------------------------------------------------------------------------
# Kernel 1: SimpleNeuMF
#   out[t, b] = relu( [u*i, u, i] @ Wcat + bias ),  Wcat = [Wg; Wmu; Wmi]
#   2-D grid over (T tiles, B tiles); user block is reused across T tiles and
#   broadcast in-kernel; output is written directly in (T, B, IN) order.
# -----------------------------------------------------------------------------
def _neumf_kernel(u_ref, i_ref, w_ref, b_ref, o_ref):
    tt = i_ref.shape[0]
    u = u_ref[...]                                     # (bt, E)   f32
    w = w_ref[...]                                     # (3E, IN)  bf16
    bias = b_ref[...]                                  # (1, IN)   f32

    def body(t, carry):
        it = i_ref[t]                                  # (bt, E)
        xcat = jnp.concatenate([u * it, u, it], axis=1)          # (bt, 3E)
        y = jnp.dot(xcat.astype(jnp.bfloat16), w,
                    preferred_element_type=jnp.float32) + bias   # (bt, IN)
        o_ref[t] = jnp.maximum(y, 0.0)
        return carry

    jax.lax.fori_loop(0, tt, body, 0, unroll=tt <= 8)


def simple_neumf(user_e, item_e_t, wcat, b, tile_t=16, tile_b=256):
    T, B, E = item_e_t.shape
    IN = wcat.shape[1]
    tt = T if T <= tile_t else tile_t
    bt = B if B <= tile_b else tile_b
    return pl.pallas_call(
        _neumf_kernel,
        out_shape=jax.ShapeDtypeStruct((T, B, IN), jnp.float32),
        grid=(pl.cdiv(T, tt), pl.cdiv(B, bt)),
        in_specs=[
            pl.BlockSpec((bt, E), lambda ti, bi: (bi, 0)),        # user (reused)
            pl.BlockSpec((tt, bt, E), lambda ti, bi: (ti, bi, 0)),
            pl.BlockSpec(wcat.shape, lambda ti, bi: (0, 0)),
            pl.BlockSpec(b.shape, lambda ti, bi: (0, 0)),
        ],
        out_specs=pl.BlockSpec((tt, bt, IN), lambda ti, bi: (ti, bi, 0)),
        compiler_params=pltpu.CompilerParams(
            dimension_semantics=("parallel", "parallel")),
    )(user_e, item_e_t, wcat, b)


# -----------------------------------------------------------------------------
# Kernel 2: MRN4GRU -- behavior-conditioned GRU.
#   phase 1 (off the serial path): for t < n_steps, one x@Wih matmul + one-hot
#   behavior/bias mix -> VMEM scratch pre[t] = [gi_r | gi_z | gi_n | bhh_n mix]
#   phase 2 (recurrence): per step only h@Whh (behavior blocks padded to 128
#   lanes so slices are aligned), gate math, masked update.
# -----------------------------------------------------------------------------
def _mrn_gru_kernel(nsteps_ref, mask_ref, x_ref, oh_ref, wih_ref, whh_ref,
                    bpre_ref, bhn_ref, o_ref, pre_ref):
    T, BB, IN = x_ref.shape
    NB, H = bhn_ref.shape
    GP = whh_ref.shape[1] // NB                        # padded behavior block
    n_steps = nsteps_ref[0]

    wih = wih_ref[...]                                 # (IN, NB*GP) bf16
    whh = whh_ref[...]                                 # (H,  NB*GP) bf16
    bpre = bpre_ref[...]                               # (NB, 3H)    f32
    bhn = bhn_ref[...]                                 # (NB, H)     f32

    # ---- phase 1: hoisted input projection + behavior / bias mixing --------
    def pre_step(t, carry):
        xt = x_ref[t]                                  # (BB, IN)
        oh_t = oh_ref[t]                               # (BB, NB)
        gi_all = jnp.dot(xt.astype(jnp.bfloat16), wih,
                         preferred_element_type=jnp.float32)     # (BB, NB*GP)
        gi = jnp.zeros((BB, 3 * H), jnp.float32)
        hb = jnp.zeros((BB, H), jnp.float32)
        for b in range(NB):                            # static, small
            w = oh_t[:, b:b + 1]                       # (BB, 1)
            gi = gi + w * (gi_all[:, b * GP:b * GP + 3 * H] + bpre[b])
            hb = hb + w * bhn[b]
        pre_ref[t] = jnp.concatenate([gi, hb], axis=1)           # (BB, 4H)
        return carry

    jax.lax.fori_loop(0, n_steps, pre_step, 0)

    # ---- phase 2: recurrence (only h @ whh + gate math on the serial path) -
    def step(t, h):                                    # h: (BB, H) f32
        gh_all = jnp.dot(h.astype(jnp.bfloat16), whh,
                         preferred_element_type=jnp.float32)     # (BB, NB*GP)
        oh_t = oh_ref[t]                               # (BB, NB)
        gh = jnp.zeros((BB, GP), jnp.float32)
        for b in range(NB):                            # 128-aligned slices
            gh = gh + oh_t[:, b:b + 1] * gh_all[:, b * GP:(b + 1) * GP]
        pre = pre_ref[t]                               # (BB, 4H)
        r = jax.nn.sigmoid(pre[:, 0:H] + gh[:, 0:H])
        z = jax.nn.sigmoid(pre[:, H:2 * H] + gh[:, H:2 * H])
        n = jnp.tanh(pre[:, 2 * H:3 * H] +
                     r * (gh[:, 2 * H:3 * H] + pre[:, 3 * H:4 * H]))
        h_new = (1.0 - z) * n + z * h
        return jnp.where(mask_ref[t] > 0, h_new, h)    # scalar mask from SMEM

    h0 = jnp.zeros((BB, H), jnp.float32)
    h_final = jax.lax.fori_loop(0, n_steps, step, h0)
    o_ref[...] = h_final.astype(o_ref.dtype)


def mrn_gru(n_steps, mask_i32, x_tbi, behav_oh, wih_cat, whh_cat, b_pre, b_hn):
    T, B, IN = x_tbi.shape
    NB = behav_oh.shape[2]
    H = b_hn.shape[1]
    bb = B if B <= 128 else 128                        # parallel batch split
    return pl.pallas_call(
        _mrn_gru_kernel,
        out_shape=jax.ShapeDtypeStruct((B, H), jnp.float32),
        grid=(pl.cdiv(B, bb),),
        in_specs=[
            pl.BlockSpec(memory_space=pltpu.MemorySpace.SMEM),   # n_steps (1,)
            pl.BlockSpec(memory_space=pltpu.MemorySpace.SMEM),   # mask (T,)
            pl.BlockSpec((T, bb, IN), lambda i: (0, i, 0)),
            pl.BlockSpec((T, bb, NB), lambda i: (0, i, 0)),
            pl.BlockSpec(wih_cat.shape, lambda i: (0, 0)),
            pl.BlockSpec(whh_cat.shape, lambda i: (0, 0)),
            pl.BlockSpec(b_pre.shape, lambda i: (0, 0)),
            pl.BlockSpec(b_hn.shape, lambda i: (0, 0)),
        ],
        out_specs=pl.BlockSpec((bb, H), lambda i: (i, 0)),
        scratch_shapes=[pltpu.VMEM((T, bb, 4 * H), jnp.float32)],
        compiler_params=pltpu.CompilerParams(
            dimension_semantics=("parallel",)),
    )(n_steps, mask_i32, x_tbi, behav_oh, wih_cat, whh_cat, b_pre, b_hn)


# -----------------------------------------------------------------------------
# Kernel 3: per-target scoring, lane-dense over the target axis.
#   score[b, n] = w3 . relu(a[b] + temb[n] @ W2t) + b3
#   cT = W2t^T @ temb^T   (E, tn) on the MXU, then accumulate over E on the VPU
#   with the (bt, tn) accumulator lane-dense; no (B, N, E) intermediate.
# -----------------------------------------------------------------------------
def _score_kernel(a_ref, w2tT_ref, tembT_ref, w3_ref, b3_ref, o_ref):
    E = a_ref.shape[1]
    cT = jnp.dot(w2tT_ref[...], tembT_ref[...],
                 preferred_element_type=jnp.float32)             # (E, tn)
    a = a_ref[...]                                               # (bt, E)
    acc = jnp.full((a.shape[0], cT.shape[1]), b3_ref[0], jnp.float32)
    for e in range(E):                                           # static
        acc = acc + w3_ref[e] * jnp.maximum(a[:, e:e + 1] + cT[e:e + 1, :], 0.0)
    o_ref[...] = acc


def _score_tile(npad):
    for cand in (512, 256, 128):
        if npad % cand == 0:
            return cand
    return npad


def score_targets(a, w2t_T, temb_T_pad, w3, b3):
    B, E = a.shape
    Npad = temb_T_pad.shape[1]
    tn = _score_tile(Npad)
    bt = B if B <= 128 else 128
    return pl.pallas_call(
        _score_kernel,
        out_shape=jax.ShapeDtypeStruct((B, Npad), jnp.float32),
        grid=(pl.cdiv(B, bt), pl.cdiv(Npad, tn)),
        in_specs=[
            pl.BlockSpec((bt, E), lambda bi, ni: (bi, 0)),
            pl.BlockSpec(w2t_T.shape, lambda bi, ni: (0, 0)),
            pl.BlockSpec((E, tn), lambda bi, ni: (0, ni)),
            pl.BlockSpec(memory_space=pltpu.MemorySpace.SMEM),   # w3 (E,)
            pl.BlockSpec(memory_space=pltpu.MemorySpace.SMEM),   # b3 (1,)
        ],
        out_specs=pl.BlockSpec((bt, tn), lambda bi, ni: (bi, ni)),
        compiler_params=pltpu.CompilerParams(
            dimension_semantics=("parallel", "parallel")),
    )(a, w2t_T, temb_T_pad, w3, b3)


# -----------------------------------------------------------------------------
# Model wrapper (parameter setup + glue in plain JAX, hot paths in Pallas)
# -----------------------------------------------------------------------------
def init_params(key, cfg):
    E, H, IN = cfg["embed_size"], cfg["hidden_size"], cfg["mrn_in_size"]
    NB, N = cfg["behavior_num"], cfg["item_num"]
    ks = jax.random.split(key, 16)

    def rnd(k, shape, scale=0.05):
        return (scale * jax.random.normal(k, shape)).astype(jnp.float32)

    item_emb = rnd(ks[1], (N + 1, E))
    item_emb = item_emb.at[0].set(0.0)                 # padding_idx = 0

    # SimpleNeuMF -- fused weight [Wg; Wmu; Wmi] for xcat = [u*i, u, i]
    wg, wmu, wmi = rnd(ks[2], (E, IN)), rnd(ks[3], (E, IN)), rnd(ks[4], (E, IN))

    # MRN4GRU -- per-behavior weights, behavior blocks padded to 128 lanes
    wih = rnd(ks[6], (NB, IN, 3 * H))
    whh = rnd(ks[7], (NB, H, 3 * H))
    bih = rnd(ks[8], (NB, 3 * H))
    bhh = rnd(ks[9], (NB, 3 * H))
    GP = ((3 * H + 127) // 128) * 128
    wih_cat = jnp.zeros((IN, NB * GP), jnp.float32)
    whh_cat = jnp.zeros((H, NB * GP), jnp.float32)
    for b in range(NB):
        wih_cat = wih_cat.at[:, b * GP:b * GP + 3 * H].set(wih[b])
        whh_cat = whh_cat.at[:, b * GP:b * GP + 3 * H].set(whh[b])
    # bhh for the r/z gates folds into the hoisted input-side bias; the n-gate
    # part stays separate because it sits inside r * ( . ).
    b_pre = bih + jnp.concatenate([bhh[:, :2 * H], jnp.zeros((NB, H))], axis=1)
    b_hn = bhh[:, 2 * H:]

    # scoring head; scoring item table is pre-stored transposed+padded+bf16
    w2 = rnd(ks[12], (H + E, E))
    Npad = max(128, ((N + 127) // 128) * 128)
    item_sc_T = jnp.zeros((E, Npad), jnp.float32).at[:, :N].set(
        item_emb[1:N + 1].T)

    return {
        "user_emb": rnd(ks[0], (cfg["user_num"], E)),
        "item_emb": item_emb,
        "nmf_wcat": jnp.concatenate([wg, wmu, wmi], axis=0).astype(jnp.bfloat16),
        "nmf_b": rnd(ks[5], (1, IN)),
        "gru_wih": wih_cat.astype(jnp.bfloat16),
        "gru_whh": whh_cat.astype(jnp.bfloat16),
        "gru_bpre": b_pre,
        "gru_bhn": b_hn,
        "w1": rnd(ks[10], (H + E, H)),
        "b1": rnd(ks[11], (1, H)),
        "w2h": w2[:H, :],
        "w2t_T": w2[H:, :].T.astype(jnp.bfloat16),
        "b2": rnd(ks[13], (1, E)),
        "w3": rnd(ks[14], (E,)),
        "b3": rnd(ks[15], (1,)),
        "item_sc_T": item_sc_T.astype(jnp.bfloat16),
    }


def mrn4rec_forward(params, cfg, user, item, behavior, mask_len):
    B, T = item.shape
    NB = cfg["behavior_num"]
    N = cfg["item_num"]

    user_e = params["user_emb"][user]                  # (B, E)
    # transpose the tiny int index matrix (not the embeddings): the activation
    # tensor is produced directly in (T, B, E) order, no big relayout later.
    item_e_t = params["item_emb"][item.T]              # (T, B, E)

    # --- SimpleNeuMF (Pallas, fused K=3E matmul, (T,B,IN) output) -----------
    x_tbi = simple_neumf(user_e, item_e_t, params["nmf_wcat"], params["nmf_b"])

    # --- MRN GRU (Pallas, hoisted input projection, batch-parallel grid) ----
    behav_oh = jax.nn.one_hot(behavior.T, NB, dtype=jnp.float32)   # (T, B, NB)
    # TODO(synk): for very long sequences pass behavior ids (T, B) int32 and
    #             build the one-hot in-kernel to cut DMA/VMEM further.
    mask_i32 = mask_len.astype(jnp.int32)                          # (T,)
    steps = jnp.where(mask_i32 > 0, jnp.arange(T, dtype=jnp.int32) + 1, 0)
    n_steps = jnp.max(steps).reshape(1)                            # (1,) int32
    core = mrn_gru(n_steps, mask_i32, x_tbi, behav_oh,
                   params["gru_wih"], params["gru_whh"],
                   params["gru_bpre"], params["gru_bhn"])          # (B, H)

    # --- target-invariant half of the scoring head (tiny -> plain JAX) ------
    x1 = jnp.concatenate([core, user_e], axis=1)                   # (B, H+E)
    h1 = jax.nn.relu(x1 @ params["w1"] + params["b1"])             # (B, H)
    a = h1 @ params["w2h"] + params["b2"]                          # (B, E)

    # --- scoring over all items (target=None path) (Pallas, lane-dense N) ---
    scores = score_targets(a, params["w2t_T"], params["item_sc_T"],
                           params["w3"], params["b3"])             # (B, Npad)
    return scores[:, :N]


if __name__ == "__main__":
    cfg = {
        "embed_size": 32,
        "hidden_size": 32,
        "mrn_in_size": 32,
        "fcl_size": 32,          # stored in __init__ but unused in forward
        "user_num": 16,
        "item_num": 128,
        "behavior_num": 3,
        "device": None,
    }
    B, T = 2, 8

    key = jax.random.PRNGKey(0)
    kp, ku, ki, kb = jax.random.split(key, 4)
    params = init_params(kp, cfg)

    user = jax.random.randint(ku, (B,), 0, cfg["user_num"])
    item = jax.random.randint(ki, (B, T), 1, cfg["item_num"] + 1)
    behavior = jax.random.randint(kb, (B, T), 0, cfg["behavior_num"])
    mask_len = jnp.array([1, 1, 1, 1, 1, 1, 0, 0], dtype=bool)     # (T,)

    scores = mrn4rec_forward(params, cfg, user, item, behavior, mask_len)
    scores = jax.block_until_ready(scores)
    assert scores.shape == (B, cfg["item_num"])
    assert bool(jnp.all(jnp.isfinite(scores)))
    print("KERNEL_OK")
</pallas_src>

<mosaic_0001>
module attributes {stable_mosaic.version = 11 : i64} {
  func.func @_neumf_kernel(%arg0: i32, %arg1: i32, %arg2: memref<2x32xf32, #tpu.memory_space<vmem>>, %arg3: memref<8x2x32xf32, #tpu.memory_space<vmem>>, %arg4: memref<96x32xbf16, #tpu.memory_space<vmem>>, %arg5: memref<1x32xf32, #tpu.memory_space<vmem>>, %arg6: memref<8x2x32xf32, #tpu.memory_space<vmem>>) attributes {dimension_semantics = [#tpu.dimension_semantics<parallel>, #tpu.dimension_semantics<parallel>], iteration_bounds = array<i64: 1, 1>, scalar_prefetch = 0 : i64, scratch_operands = 0 : i64, tpu.core_type = #tpu.core_type<tc>, window_params = [{transform_indices = @transform_0, window_bounds = array<i64: 2, 32>}, {transform_indices = @transform_1, window_bounds = array<i64: 8, 2, 32>}, {pipeline_mode = #tpu.pipeline_mode<synchronous>, transform_indices = @transform_2, window_bounds = array<i64: 96, 32>}, {pipeline_mode = #tpu.pipeline_mode<synchronous>, transform_indices = @transform_3, window_bounds = array<i64: 1, 32>}, {transform_indices = @transform_4, window_bounds = array<i64: 8, 2, 32>}]} {
    %c0 = arith.constant 0 : index
    %c0_0 = arith.constant 0 : index
    %0 = vector.load %arg2[%c0, %c0_0] : memref<2x32xf32, #tpu.memory_space<vmem>>, vector<2x32xf32>
    %c0_1 = arith.constant 0 : index
    %c0_2 = arith.constant 0 : index
    %1 = vector.load %arg4[%c0_1, %c0_2] : memref<96x32xbf16, #tpu.memory_space<vmem>>, vector<96x32xbf16>
    %c0_3 = arith.constant 0 : index
    %c0_4 = arith.constant 0 : index
    %2 = vector.load %arg5[%c0_3, %c0_4] : memref<1x32xf32, #tpu.memory_space<vmem>>, vector<1x32xf32>
    %c0_i32 = arith.constant 0 : i32
    %3 = arith.index_cast %c0_i32 : i32 to index
    %c0_5 = arith.constant 0 : index
    %c0_6 = arith.constant 0 : index
    %4 = vector.load %arg3[%3, %c0_5, %c0_6] : memref<8x2x32xf32, #tpu.memory_space<vmem>>, vector<1x2x32xf32>
    %5 = vector.shape_cast %4 : vector<1x2x32xf32> to vector<2x32xf32>
    %6 = arith.mulf %0, %5 : vector<2x32xf32>
    %7 = tpu.concatenate %6, %0, %5 in 1 : vector<2x32xf32>, vector<2x32xf32>, vector<2x32xf32> -> vector<2x96xf32>
    %8 = arith.truncf %7 : vector<2x96xf32> to vector<2x96xbf16>
    %cst = arith.constant dense<0.000000e+00> : vector<2x32xf32>
    %9 = tpu.matmul %8, %1, %cst {dimension_numbers = #tpu.dot_dimension_numbers<[1], [0], [0], [1], [0, 0, 1, 1], [], []>} : vector<2x96xbf16>, vector<96x32xbf16>, vector<2x32xf32> -> vector<2x32xf32>
    %10 = vector.broadcast %2 : vector<1x32xf32> to vector<2x32xf32>
    %11 = arith.addf %9, %10 : vector<2x32xf32>
    %cst_7 = arith.constant 0.000000e+00 : f32
    %12 = vector.broadcast %cst_7 : f32 to vector<2x32xf32>
    %13 = arith.maximumf %11, %12 : vector<2x32xf32>
    %14 = arith.index_cast %c0_i32 : i32 to index
    %c0_8 = arith.constant 0 : index
    %c0_9 = arith.constant 0 : index
    %15 = vector.load %arg6[%14, %c0_8, %c0_9] : memref<8x2x32xf32, #tpu.memory_space<vmem>>, vector<1x2x32xf32>
    %16 = vector.shape_cast %15 : vector<1x2x32xf32> to vector<2x32xf32>
    %17 = vector.shape_cast %13 : vector<2x32xf32> to vector<1x2x32xf32>
    tpu.vector_store %arg6[%14, %c0_8, %c0_9], %17 {strides = array<i32>} : memref<8x2x32xf32, #tpu.memory_space<vmem>>, vector<1x2x32xf32>,
    %c1_i32 = arith.constant 1 : i32
    %18 = arith.index_cast %c1_i32 : i32 to index
    %c0_10 = arith.constant 0 : index
    %c0_11 = arith.constant 0 : index
    %19 = vector.load %arg3[%18, %c0_10, %c0_11] : memref<8x2x32xf32, #tpu.memory_space<vmem>>, vector<1x2x32xf32>
    %20 = vector.shape_cast %19 : vector<1x2x32xf32> to vector<2x32xf32>
    %21 = arith.mulf %0, %20 : vector<2x32xf32>
    %22 = tpu.concatenate %21, %0, %20 in 1 : vector<2x32xf32>, vector<2x32xf32>, vector<2x32xf32> -> vector<2x96xf32>
    %23 = arith.truncf %22 : vector<2x96xf32> to vector<2x96xbf16>
    %cst_12 = arith.constant dense<0.000000e+00> : vector<2x32xf32>
    %24 = tpu.matmul %23, %1, %cst_12 {dimension_numbers = #tpu.dot_dimension_numbers<[1], [0], [0], [1], [0, 0, 1, 1], [], []>} : vector<2x96xbf16>, vector<96x32xbf16>, vector<2x32xf32> -> vector<2x32xf32>
    %25 = vector.broadcast %2 : vector<1x32xf32> to vector<2x32xf32>
    %26 = arith.addf %24, %25 : vector<2x32xf32>
    %cst_13 = arith.constant 0.000000e+00 : f32
    %27 = vector.broadcast %cst_13 : f32 to vector<2x32xf32>
    %28 = arith.maximumf %26, %27 : vector<2x32xf32>
    %29 = arith.index_cast %c1_i32 : i32 to index
    %c0_14 = arith.constant 0 : index
    %c0_15 = arith.constant 0 : index
    %30 = vector.load %arg6[%29, %c0_14, %c0_15] : memref<8x2x32xf32, #tpu.memory_space<vmem>>, vector<1x2x32xf32>
    %31 = vector.shape_cast %30 : vector<1x2x32xf32> to vector<2x32xf32>
    %32 = vector.shape_cast %28 : vector<2x32xf32> to vector<1x2x32xf32>
    tpu.vector_store %arg6[%29, %c0_14, %c0_15], %32 {strides = array<i32>} : memref<8x2x32xf32, #tpu.memory_space<vmem>>, vector<1x2x32xf32>,
    %c2_i32 = arith.constant 2 : i32
    %33 = arith.index_cast %c2_i32 : i32 to index
    %c0_16 = arith.constant 0 : index
    %c0_17 = arith.constant 0 : index
    %34 = vector.load %arg3[%33, %c0_16, %c0_17] : memref<8x2x32xf32, #tpu.memory_space<vmem>>, vector<1x2x32xf32>
    %35 = vector.shape_cast %34 : vector<1x2x32xf32> to vector<2x32xf32>
    %36 = arith.mulf %0, %35 : vector<2x32xf32>
    %37 = tpu.concatenate %36, %0, %35 in 1 : vector<2x32xf32>, vector<2x32xf32>, vector<2x32xf32> -> vector<2x96xf32>
    %38 = arith.truncf %37 : vector<2x96xf32> to vector<2x96xbf16>
    %cst_18 = arith.constant dense<0.000000e+00> : vector<2x32xf32>
    %39 = tpu.matmul %38, %1, %cst_18 {dimension_numbers = #tpu.dot_dimension_numbers<[1], [0], [0], [1], [0, 0, 1, 1], [], []>} : vector<2x96xbf16>, vector<96x32xbf16>, vector<2x32xf32> -> vector<2x32xf32>
    %40 = vector.broadcast %2 : vector<1x32xf32> to vector<2x32xf32>
    %41 = arith.addf %39, %40 : vector<2x32xf32>
    %cst_19 = arith.constant 0.000000e+00 : f32
    %42 = vector.broadcast %cst_19 : f32 to vector<2x32xf32>
    %43 = arith.maximumf %41, %42 : vector<2x32xf32>
    %44 = arith.index_cast %c2_i32 : i32 to index
    %c0_20 = arith.constant 0 : index
    %c0_21 = arith.constant 0 : index
    %45 = vector.load %arg6[%44, %c0_20, %c0_21] : memref<8x2x32xf32, #tpu.memory_space<vmem>>, vector<1x2x32xf32>
    %46 = vector.shape_cast %45 : vector<1x2x32xf32> to vector<2x32xf32>
    %47 = vector.shape_cast %43 : vector<2x32xf32> to vector<1x2x32xf32>
    tpu.vector_store %arg6[%44, %c0_20, %c0_21], %47 {strides = array<i32>} : memref<8x2x32xf32, #tpu.memory_space<vmem>>, vector<1x2x32xf32>,
    %c3_i32 = arith.constant 3 : i32
    %48 = arith.index_cast %c3_i32 : i32 to index
    %c0_22 = arith.constant 0 : index
    %c0_23 = arith.constant 0 : index
    %49 = vector.load %arg3[%48, %c0_22, %c0_23] : memref<8x2x32xf32, #tpu.memory_space<vmem>>, vector<1x2x32xf32>
    %50 = vector.shape_cast %49 : vector<1x2x32xf32> to vector<2x32xf32>
    %51 = arith.mulf %0, %50 : vector<2x32xf32>
    %52 = tpu.concatenate %51, %0, %50 in 1 : vector<2x32xf32>, vector<2x32xf32>, vector<2x32xf32> -> vector<2x96xf32>
    %53 = arith.truncf %52 : vector<2x96xf32> to vector<2x96xbf16>
    %cst_24 = arith.constant dense<0.000000e+00> : vector<2x32xf32>
    %54 = tpu.matmul %53, %1, %cst_24 {dimension_numbers = #tpu.dot_dimension_numbers<[1], [0], [0], [1], [0, 0, 1, 1], [], []>} : vector<2x96xbf16>, vector<96x32xbf16>, vector<2x32xf32> -> vector<2x32xf32>
    %55 = vector.broadcast %2 : vector<1x32xf32> to vector<2x32xf32>
    %56 = arith.addf %54, %55 : vector<2x32xf32>
    %cst_25 = arith.constant 0.000000e+00 : f32
    %57 = vector.broadcast %cst_25 : f32 to vector<2x32xf32>
    %58 = arith.maximumf %56, %57 : vector<2x32xf32>
    %59 = arith.index_cast %c3_i32 : i32 to index
    %c0_26 = arith.constant 0 : index
    %c0_27 = arith.constant 0 : index
    %60 = vector.load %arg6[%59, %c0_26, %c0_27] : memref<8x2x32xf32, #tpu.memory_space<vmem>>, vector<1x2x32xf32>
    %61 = vector.shape_cast %60 : vector<1x2x32xf32> to vector<2x32xf32>
    %62 = vector.shape_cast %58 : vector<2x32xf32> to vector<1x2x32xf32>
    tpu.vector_store %arg6[%59, %c0_26, %c0_27], %62 {strides = array<i32>} : memref<8x2x32xf32, #tpu.memory_space<vmem>>, vector<1x2x32xf32>,
    %c4_i32 = arith.constant 4 : i32
    %63 = arith.index_cast %c4_i32 : i32 to index
    %c0_28 = arith.constant 0 : index
    %c0_29 = arith.constant 0 : index
    %64 = vector.load %arg3[%63, %c0_28, %c0_29] : memref<8x2x32xf32, #tpu.memory_space<vmem>>, vector<1x2x32xf32>
    %65 = vector.shape_cast %64 : vector<1x2x32xf32> to vector<2x32xf32>
    %66 = arith.mulf %0, %65 : vector<2x32xf32>
    %67 = tpu.concatenate %66, %0, %65 in 1 : vector<2x32xf32>, vector<2x32xf32>, vector<2x32xf32> -> vector<2x96xf32>
    %68 = arith.truncf %67 : vector<2x96xf32> to vector<2x96xbf16>
    %cst_30 = arith.constant dense<0.000000e+00> : vector<2x32xf32>
    %69 = tpu.matmul %68, %1, %cst_30 {dimension_numbers = #tpu.dot_dimension_numbers<[1], [0], [0], [1], [0, 0, 1, 1], [], []>} : vector<2x96xbf16>, vector<96x32xbf16>, vector<2x32xf32> -> vector<2x32xf32>
    %70 = vector.broadcast %2 : vector<1x32xf32> to vector<2x32xf32>
    %71 = arith.addf %69, %70 : vector<2x32xf32>
    %cst_31 = arith.constant 0.000000e+00 : f32
    %72 = vector.broadcast %cst_31 : f32 to vector<2x32xf32>
    %73 = arith.maximumf %71, %72 : vector<2x32xf32>
    %74 = arith.index_cast %c4_i32 : i32 to index
    %c0_32 = arith.constant 0 : index
    %c0_33 = arith.constant 0 : index
    %75 = vector.load %arg6[%74, %c0_32, %c0_33] : memref<8x2x32xf32, #tpu.memory_space<vmem>>, vector<1x2x32xf32>
    %76 = vector.shape_cast %75 : vector<1x2x32xf32> to vector<2x32xf32>
    %77 = vector.shape_cast %73 : vector<2x32xf32> to vector<1x2x32xf32>
    tpu.vector_store %arg6[%74, %c0_32, %c0_33], %77 {strides = array<i32>} : memref<8x2x32xf32, #tpu.memory_space<vmem>>, vector<1x2x32xf32>,
    %c5_i32 = arith.constant 5 : i32
    %78 = arith.index_cast %c5_i32 : i32 to index
    %c0_34 = arith.constant 0 : index
    %c0_35 = arith.constant 0 : index
    %79 = vector.load %arg3[%78, %c0_34, %c0_35] : memref<8x2x32xf32, #tpu.memory_space<vmem>>, vector<1x2x32xf32>
    %80 = vector.shape_cast %79 : vector<1x2x32xf32> to vector<2x32xf32>
    %81 = arith.mulf %0, %80 : vector<2x32xf32>
    %82 = tpu.concatenate %81, %0, %80 in 1 : vector<2x32xf32>, vector<2x32xf32>, vector<2x32xf32> -> vector<2x96xf32>
    %83 = arith.truncf %82 : vector<2x96xf32> to vector<2x96xbf16>
    %cst_36 = arith.constant dense<0.000000e+00> : vector<2x32xf32>
    %84 = tpu.matmul %83, %1, %cst_36 {dimension_numbers = #tpu.dot_dimension_numbers<[1], [0], [0], [1], [0, 0, 1, 1], [], []>} : vector<2x96xbf16>, vector<96x32xbf16>, vector<2x32xf32> -> vector<2x32xf32>
    %85 = vector.broadcast %2 : vector<1x32xf32> to vector<2x32xf32>
    %86 = arith.addf %84, %85 : vector<2x32xf32>
    %cst_37 = arith.constant 0.000000e+00 : f32
    %87 = vector.broadcast %cst_37 : f32 to vector<2x32xf32>
    %88 = arith.maximumf %86, %87 : vector<2x32xf32>
    %89 = arith.index_cast %c5_i32 : i32 to index
    %c0_38 = arith.constant 0 : index
    %c0_39 = arith.constant 0 : index
    %90 = vector.load %arg6[%89, %c0_38, %c0_39] : memref<8x2x32xf32, #tpu.memory_space<vmem>>, vector<1x2x32xf32>
    %91 = vector.shape_cast %90 : vector<1x2x32xf32> to vector<2x32xf32>
    %92 = vector.shape_cast %88 : vector<2x32xf32> to vector<1x2x32xf32>
    tpu.vector_store %arg6[%89, %c0_38, %c0_39], %92 {strides = array<i32>} : memref<8x2x32xf32, #tpu.memory_space<vmem>>, vector<1x2x32xf32>,
    %c6_i32 = arith.constant 6 : i32
    %93 = arith.index_cast %c6_i32 : i32 to index
    %c0_40 = arith.constant 0 : index
    %c0_41 = arith.constant 0 : index
    %94 = vector.load %arg3[%93, %c0_40, %c0_41] : memref<8x2x32xf32, #tpu.memory_space<vmem>>, vector<1x2x32xf32>
    %95 = vector.shape_cast %94 : vector<1x2x32xf32> to vector<2x32xf32>
    %96 = arith.mulf %0, %95 : vector<2x32xf32>
    %97 = tpu.concatenate %96, %0, %95 in 1 : vector<2x32xf32>, vector<2x32xf32>, vector<2x32xf32> -> vector<2x96xf32>
    %98 = arith.truncf %97 : vector<2x96xf32> to vector<2x96xbf16>
    %cst_42 = arith.constant dense<0.000000e+00> : vector<2x32xf32>
    %99 = tpu.matmul %98, %1, %cst_42 {dimension_numbers = #tpu.dot_dimension_numbers<[1], [0], [0], [1], [0, 0, 1, 1], [], []>} : vector<2x96xbf16>, vector<96x32xbf16>, vector<2x32xf32> -> vector<2x32xf32>
    %100 = vector.broadcast %2 : vector<1x32xf32> to vector<2x32xf32>
    %101 = arith.addf %99, %100 : vector<2x32xf32>
    %cst_43 = arith.constant 0.000000e+00 : f32
    %102 = vector.broadcast %cst_43 : f32 to vector<2x32xf32>
    %103 = arith.maximumf %101, %102 : vector<2x32xf32>
    %104 = arith.index_cast %c6_i32 : i32 to index
    %c0_44 = arith.constant 0 : index
    %c0_45 = arith.constant 0 : index
    %105 = vector.load %arg6[%104, %c0_44, %c0_45] : memref<8x2x32xf32, #tpu.memory_space<vmem>>, vector<1x2x32xf32>
    %106 = vector.shape_cast %105 : vector<1x2x32xf32> to vector<2x32xf32>
    %107 = vector.shape_cast %103 : vector<2x32xf32> to vector<1x2x32xf32>
    tpu.vector_store %arg6[%104, %c0_44, %c0_45], %107 {strides = array<i32>} : memref<8x2x32xf32, #tpu.memory_space<vmem>>, vector<1x2x32xf32>,
    %c7_i32 = arith.constant 7 : i32
    %108 = arith.index_cast %c7_i32 : i32 to index
    %c0_46 = arith.constant 0 : index
    %c0_47 = arith.constant 0 : index
    %109 = vector.load %arg3[%108, %c0_46, %c0_47] : memref<8x2x32xf32, #tpu.memory_space<vmem>>, vector<1x2x32xf32>
    %110 = vector.shape_cast %109 : vector<1x2x32xf32> to vector<2x32xf32>
    %111 = arith.mulf %0, %110 : vector<2x32xf32>
    %112 = tpu.concatenate %111, %0, %110 in 1 : vector<2x32xf32>, vector<2x32xf32>, vector<2x32xf32> -> vector<2x96xf32>
    %113 = arith.truncf %112 : vector<2x96xf32> to vector<2x96xbf16>
    %cst_48 = arith.constant dense<0.000000e+00> : vector<2x32xf32>
    %114 = tpu.matmul %113, %1, %cst_48 {dimension_numbers = #tpu.dot_dimension_numbers<[1], [0], [0], [1], [0, 0, 1, 1], [], []>} : vector<2x96xbf16>, vector<96x32xbf16>, vector<2x32xf32> -> vector<2x32xf32>
    %115 = vector.broadcast %2 : vector<1x32xf32> to vector<2x32xf32>
    %116 = arith.addf %114, %115 : vector<2x32xf32>
    %cst_49 = arith.constant 0.000000e+00 : f32
    %117 = vector.broadcast %cst_49 : f32 to vector<2x32xf32>
    %118 = arith.maximumf %116, %117 : vector<2x32xf32>
    %119 = arith.index_cast %c7_i32 : i32 to index
    %c0_50 = arith.constant 0 : index
    %c0_51 = arith.constant 0 : index
    %120 = vector.load %arg6[%119, %c0_50, %c0_51] : memref<8x2x32xf32, #tpu.memory_space<vmem>>, vector<1x2x32xf32>
    %121 = vector.shape_cast %120 : vector<1x2x32xf32> to vector<2x32xf32>
    %122 = vector.shape_cast %118 : vector<2x32xf32> to vector<1x2x32xf32>
    tpu.vector_store %arg6[%119, %c0_50, %c0_51], %122 {strides = array<i32>} : memref<8x2x32xf32, #tpu.memory_space<vmem>>, vector<1x2x32xf32>,
    %c8_i32 = arith.constant 8 : i32
    return
  }
  func.func @transform_0(%arg0: i32, %arg1: i32) -> (i32, i32) {
    %c0_i32 = arith.constant 0 : i32
    %c0_i32_0 = arith.constant 0 : i32
    return %arg1, %c0_i32 : i32, i32
  }
  func.func @transform_1(%arg0: i32, %arg1: i32) -> (i32, i32, i32) {
    %c0_i32 = arith.constant 0 : i32
    %c0_i32_0 = arith.constant 0 : i32
    return %arg0, %arg1, %c0_i32 : i32, i32, i32
  }
  func.func @transform_2(%arg0: i32, %arg1: i32) -> (i32, i32) {
    %c0_i32 = arith.constant 0 : i32
    %c0_i32_0 = arith.constant 0 : i32
    %c0_i32_1 = arith.constant 0 : i32
    return %c0_i32, %c0_i32_0 : i32, i32
  }
  func.func @transform_3(%arg0: i32, %arg1: i32) -> (i32, i32) {
    %c0_i32 = arith.constant 0 : i32
    %c0_i32_0 = arith.constant 0 : i32
    %c0_i32_1 = arith.constant 0 : i32
    return %c0_i32, %c0_i32_0 : i32, i32
  }
  func.func @transform_4(%arg0: i32, %arg1: i32) -> (i32, i32, i32) {
    %c0_i32 = arith.constant 0 : i32
    %c0_i32_0 = arith.constant 0 : i32
    return %arg0, %arg1, %c0_i32 : i32, i32, i32
  }
}

</mosaic_0001>

<bundles_post_ra>
// kernel: tpu_custom_call.1
= control target key start
LH: loop header
LB: loop body
LE: loop exit
PB: predicated region body
PF: predicated region fallthrough
CT: control target
= control target key end

     0   :  { %s807_s19 = smov 32   ;;  %s808_s7 = smov 64   ;;  %v809_v22 = vmov 0.0   ;;  %vm810_vm0 = vmmov 0   ;;  %s1090_s0 = inlined_call_operand.vmem [shape: f32[2,32], index: 0, kind: input, shape index: {}]   ;;  %s1091_s1 = inlined_call_operand.vmem [shape: f32[8,2,32], index: 1, kind: input, shape index: {}]   ;;  %s1092_s2 = inlined_call_operand.vmem [shape: bf16[96,32], index: 2, kind: input, shape index: {}]   ;;  %s1093_s3 = inlined_call_operand.vmem [shape: f32[1,32], index: 3, kind: input, shape index: {}]   ;;  %s1094_s4 = inlined_call_operand.hbm [shape: f32[8,2,32], index: 4, kind: output, shape index: {}]  }
   0x1   :  { %v19_v0 = vld [vmem:[%s1090_s0] sm:$0x3]  ;;  %v555_v1 = vld [vmem:[%s1091_s1 + $0x4] sm:$0x3]  ;;  %v557_v2 = vld [vmem:[%s1091_s1 + $0x6] sm:$0x3]  ;;  %623 = vmatprep.subr.bf16.mxu0 %v809_v22  ;;  %639 = vmatprep.subr.bf16.mxu1 %v809_v22 }
   0x2   :  { %36 = vrot.lane.b32.xlu0 %v19_v0, %s807_s19  ;;  %v848_v3 = vmul.f32 %v555_v1, %v19_v0  ;;  %v33_v4 = vld [vmem:[%s1091_s1] sm:$0x3]  ;;  %v553_v5 = vld [vmem:[%s1091_s1 + $0x2] sm:$0x3]  ;;  %v762_v6 = vpack.i.bf16 %v557_v2, %v555_v1  ;;  %v856_v7 = vmul.f32 %v557_v2, %v19_v0  ;;  %v559_v10 = vld [vmem:[%s1091_s1 + $0x8] sm:$0x3]  ;;  %635 = vmatprep.mubr.msk.bf16.mxu0 %vm810_vm0, %v809_v22 }
   0x3   :  { %v757_v8 = vpack.i.bf16 %v553_v5, %v33_v4  ;;  %v858_v9 = vmul.f32 %v33_v4, %v19_v0  ;;  %v561_v11 = vld [vmem:[%s1091_s1 + $0xa] sm:$0x3]  ;;  %v563_v12 = vld [vmem:[%s1091_s1 + $0xc] sm:$0x3]  ;;  %v139_v13 = vmul.f32 %v553_v5, %v19_v0  ;;  %v869_v14 = vmul.f32 %v559_v10, %v19_v0  ;;  %v565_v16 = vld [vmem:[%s1091_s1 + $0xe] sm:$0x3] }
   0x4   :  { %v871_v15 = vmul.f32 %v561_v11, %v19_v0  ;;  %763 = vrot.lane.b32.xlu1 %v762_v6, %s808_s7  ;;  %v767_v17 = vpack.i.bf16 %v561_v11, %v559_v10  ;;  %v419_v18 = vmul.f32 %v563_v12, %v19_v0  ;;  %v475_v19 = vmul.f32 %v565_v16, %v19_v0  ;;  %v879_v20 = vld [vmem:[%s1092_s2] sm:$0xff]   ;;  %v887_v23 = vld [vmem:[%s1092_s2 + $0x8] sm:$0xff]  }
   0x5   :  { %v772_v21 = vpack.i.bf16 %v565_v16, %v563_v12  ;;  %624 = vmatpush3.bf16.msra.mxu0 %v879_v20  ;;  %640 = vmatpush3.bf16.msra.mxu1 %v879_v20 }
   0x6   :  { %758 = vrot.lane.b32.xlu0 %v757_v8, %s808_s7  ;;  %625 = vmatprep.subr.bf16.mxu0 %v809_v22 }
   0x7   :  { %641 = vmatprep.subr.bf16.mxu1 %v809_v22 }
   0x8   :  { %768 = vrot.lane.b32.xlu1 %v767_v17, %s808_s7 }
   0xa   :  { %773 = vrot.lane.b32.xlu0 %v772_v21, %s808_s7 }
   0xb   :  { %9 = vsyncpa [#allocation3], 0  ;;  %626 = vmatpush3.bf16.msra.mxu0 %v887_v23  ;;  %v898_v24 = vld [vmem:[%s1092_s2 + $0x10] sm:$0xff]   ;;  %651 = vmatprep.mubr.msk.bf16.mxu1 %vm810_vm0, %v809_v22  ;;  %v909_v25 = vld [vmem:[%s1092_s2 + $0x18] sm:$0xff]   ;;  %vm43_vm1 = vcmask 261120   ;;  %vm45_vm2 = vcmask 523264  }
   0xc   :  { %642 = vmatpush3.bf16.msra.mxu1 %v887_v23  ;;  %627 = vmatprep.subr.bf16.mxu0 %v809_v22  ;;  %v918_v26 = vld [vmem:[%s1092_s2 + $0x20] sm:$0xff]   ;;  %v927_v27 = vld [vmem:[%s1092_s2 + $0x28] sm:$0xff]   ;;  %vm90_vm3 = vcmask 785408   ;;  %vm135_vm4 = vcmask 254976  }
   0xd   :  { %643 = vmatprep.subr.bf16.mxu1 %v809_v22  ;;  %v545_v1 = vld [vmem:[%s1093_s3] ss:$0 sm:$0xff]  ;;  %s811_s3 = smov [#allocation2]  }
   0xe   :  { %s534_s21 = sshll.u32 %s811_s3, 4  ;;  %s535_s21 = int_to_ptr.vmem [resolvable:$true] %s534_s21 }
   0xf   :  { %628 = vmatpush3.bf16.msra.mxu0 %v898_v24  ;;  %s783_s22 = scalar_lea.vmem %s535_s21, 256  ;;  %p788_p1 = scmp.lt.s32.totalorder %s535_s21, %s535_s21 }
  0x10   :  { %644 = vmatpush3.bf16.msra.mxu1 %v898_v24  ;;  %629 = vmatprep.subr.bf16.mxu0 %v809_v22  ;;  %p784_p0 = scmp.ne.s32.totalorder %s535_s21, %s783_s22  ;;  %p789_p2 = scmp.lt.s32.totalorder %s783_s22, %s783_s22 }
  0x11   :  { %645 = vmatprep.subr.bf16.mxu1 %v809_v22 }
  0x12   :  { %p790_p3 = por %p789_p2, %p788_p1 }
  0x13   :  { %630 = vmatpush3.bf16.msra.mxu0 %v909_v25 }
  0x14   :  { %646 = vmatpush3.bf16.msra.mxu1 %v909_v25  ;;  %631 = vmatprep.subr.bf16.mxu0 %v809_v22  ;;  %p791_p4 = pnand %p790_p3, %p784_p0 }
  0x15   :  { %647 = vmatprep.subr.bf16.mxu1 %v809_v22 }
  0x17   :  { %632 = vmatpush3.bf16.msra.mxu0 %v918_v26 }
  0x18   :  { %648 = vmatpush3.bf16.msra.mxu1 %v918_v26  ;;  %633 = vmatprep.subr.bf16.mxu0 %v809_v22 }
  0x19   :  { %649 = vmatprep.subr.bf16.mxu1 %v809_v22 }
  0x1b   :  { %634 = vmatpush3.bf16.msra.mxu0 %v927_v27 }
  0x1c   :  { %650 = vmatpush3.bf16.msra.mxu1 %v927_v27  ;;  %655 = vmatprep.subr.bf16.mxu0 %v809_v22 }
  0x1d   :  { %671 = vmatprep.subr.bf16.mxu1 %v809_v22 }
  0x74   :  { %v936_v28 = vpop.permute.xlu0 %36 }
  0x75   :  { %v424_v29 = vsel %vm43_vm1, %v419_v18, %v936_v28  ;;  %v480_v30 = vsel %vm43_vm1, %v475_v19, %v936_v28  ;;  %v44_v34 = vsel %vm43_vm1, %v858_v9, %v936_v28  ;;  %v144_v35 = vsel %vm43_vm1, %v139_v13, %v936_v28 }
  0x76   :  { %v764_v45 = vpop.permute.xlu1 %763  ;;  %v200_v48 = vsel %vm43_vm1, %v848_v3, %v936_v28  ;;  %v256_v50 = vsel %vm43_vm1, %v856_v7, %v936_v28  ;;  %v312_v57 = vsel %vm43_vm1, %v869_v14, %v936_v28  ;;  %v368_v59 = vsel %vm43_vm1, %v871_v15, %v936_v28 }
  0x77   :  { %v765_v46 = vunpack.i.l.bf16 %v764_v45  ;;  %v766_v47 = vunpack.i.h.bf16 %v764_v45 }
  0x78   :  { %v759_v31 = vpop.permute.xlu0 %758 }
  0x79   :  { %v761_v32 = vunpack.i.h.bf16 %v759_v31  ;;  %v760_v33 = vunpack.i.l.bf16 %v759_v31  ;;  %v201_v49 = vsel %vm45_vm2, %v200_v48, %v765_v46  ;;  %v257_v51 = vsel %vm45_vm2, %v256_v50, %v766_v47 }
  0x7a   :  { %v202_v52 = vpack.c.bf16 %v201_v49, %v201_v49  ;;  %v258_v53 = vpack.c.bf16 %v257_v51, %v257_v51  ;;  %v769_v54 = vpop.permute.xlu1 %768 }
  0x7b   :  { %v46_v36 = vsel %vm45_vm2, %v44_v34, %v760_v33  ;;  %v145_v37 = vsel %vm45_vm2, %v144_v35, %v761_v32  ;;  %v770_v55 = vunpack.i.l.bf16 %v769_v54  ;;  %v771_v56 = vunpack.i.h.bf16 %v769_v54 }
  0x7c   :  { %v47_v38 = vpack.c.bf16 %v46_v36, %v46_v36  ;;  %v146_v39 = vpack.c.bf16 %v145_v37, %v145_v37  ;;  %v774_v40 = vpop.permute.xlu0 %773 }
  0x7d   :  { %v776_v41 = vunpack.i.h.bf16 %v774_v40  ;;  %v775_v42 = vunpack.i.l.bf16 %v774_v40  ;;  %v313_v58 = vsel %vm45_vm2, %v312_v57, %v770_v55  ;;  %v369_v60 = vsel %vm45_vm2, %v368_v59, %v771_v56 }
  0x7e   :  { %636 = vmatmul.mubr.msk.bf16.vlgmr.msra.gmra.mrb[0].mxu0 %vm90_vm3, %v47_v38  ;;  %652 = vmatmul.mubr.msk.bf16.vlgmr.msra.gmra.mrb[0].mxu1 %vm90_vm3, %v146_v39  ;;  %v314_v61 = vpack.c.bf16 %v313_v58, %v313_v58  ;;  %v370_v62 = vpack.c.bf16 %v369_v60, %v369_v60 }
  0x7f   :  { %v952_v43 = vsel %vm45_vm2, %v424_v29, %v775_v42  ;;  %v955_v44 = vsel %vm45_vm2, %v480_v30, %v776_v41  ;;  %656 = vmatpush3.bf16.msra.mxu0 %v879_v20  ;;  %672 = vmatpush3.bf16.msra.mxu1 %v879_v20 }
  0x80   :  { %657 = vmatprep.subr.bf16.mxu0 %v809_v22  ;;  %673 = vmatprep.subr.bf16.mxu1 %v809_v22  ;;  %v426_v63 = vpack.c.bf16 %v952_v43, %v952_v43  ;;  %v482_v0 = vpack.c.bf16 %v955_v44, %v955_v44 }
  0x81   :  { %667 = vmatprep.mubr.msk.bf16.mxu0 %vm810_vm0, %v809_v22  ;;  %683 = vmatprep.mubr.msk.bf16.mxu1 %vm810_vm0, %v809_v22 }
  0x83   :  { %658 = vmatpush3.bf16.msra.mxu0 %v887_v23  ;;  %674 = vmatpush3.bf16.msra.mxu1 %v887_v23 }
  0x84   :  { %659 = vmatprep.subr.bf16.mxu0 %v809_v22  ;;  %675 = vmatprep.subr.bf16.mxu1 %v809_v22 }
  0x87   :  { %660 = vmatpush3.bf16.msra.mxu0 %v898_v24  ;;  %676 = vmatpush3.bf16.msra.mxu1 %v898_v24 }
  0x88   :  { %661 = vmatprep.subr.bf16.mxu0 %v809_v22  ;;  %677 = vmatprep.subr.bf16.mxu1 %v809_v22 }
  0x8b   :  { %662 = vmatpush3.bf16.msra.mxu0 %v909_v25  ;;  %678 = vmatpush3.bf16.msra.mxu1 %v909_v25 }
  0x8c   :  { %663 = vmatprep.subr.bf16.mxu0 %v809_v22  ;;  %679 = vmatprep.subr.bf16.mxu1 %v809_v22 }
  0x8f   :  { %664 = vmatpush3.bf16.msra.mxu0 %v918_v26  ;;  %680 = vmatpush3.bf16.msra.mxu1 %v918_v26 }
  0x90   :  { %665 = vmatprep.subr.bf16.mxu0 %v809_v22  ;;  %681 = vmatprep.subr.bf16.mxu1 %v809_v22 }
  0x93   :  { %666 = vmatpush3.bf16.msra.mxu0 %v927_v27  ;;  %682 = vmatpush3.bf16.msra.mxu1 %v927_v27 }
  0x94   :  { %687 = vmatprep.subr.bf16.mxu0 %v809_v22  ;;  %703 = vmatprep.subr.bf16.mxu1 %v809_v22 }
  0x96   :  { %668 = vmatmul.mubr.msk.bf16.vlgmr.msra.gmra.mrb[4].mxu0 %vm90_vm3, %v202_v52  ;;  %684 = vmatmul.mubr.msk.bf16.vlgmr.msra.gmra.mrb[4].mxu1 %vm90_vm3, %v258_v53 }
  0x97   :  { %688 = vmatpush3.bf16.msra.mxu0 %v879_v20  ;;  %704 = vmatpush3.bf16.msra.mxu1 %v879_v20 }
  0x98   :  { %689 = vmatprep.subr.bf16.mxu0 %v809_v22  ;;  %705 = vmatprep.subr.bf16.mxu1 %v809_v22 }
  0x99   :  { %699 = vmatprep.mubr.msk.bf16.mxu0 %vm810_vm0, %v809_v22  ;;  %715 = vmatprep.mubr.msk.bf16.mxu1 %vm810_vm0, %v809_v22 }
  0x9b   :  { %690 = vmatpush3.bf16.msra.mxu0 %v887_v23  ;;  %706 = vmatpush3.bf16.msra.mxu1 %v887_v23 }
  0x9c   :  { %691 = vmatprep.subr.bf16.mxu0 %v809_v22  ;;  %707 = vmatprep.subr.bf16.mxu1 %v809_v22 }
  0x9f   :  { %692 = vmatpush3.bf16.msra.mxu0 %v898_v24  ;;  %708 = vmatpush3.bf16.msra.mxu1 %v898_v24 }
  0xa0   :  { %693 = vmatprep.subr.bf16.mxu0 %v809_v22  ;;  %709 = vmatprep.subr.bf16.mxu1 %v809_v22 }
  0xa3   :  { %694 = vmatpush3.bf16.msra.mxu0 %v909_v25  ;;  %710 = vmatpush3.bf16.msra.mxu1 %v909_v25 }
  0xa4   :  { %695 = vmatprep.subr.bf16.mxu0 %v809_v22  ;;  %711 = vmatprep.subr.bf16.mxu1 %v809_v22 }
  0xa7   :  { %696 = vmatpush3.bf16.msra.mxu0 %v918_v26  ;;  %712 = vmatpush3.bf16.msra.mxu1 %v918_v26 }
  0xa8   :  { %697 = vmatprep.subr.bf16.mxu0 %v809_v22  ;;  %713 = vmatprep.subr.bf16.mxu1 %v809_v22 }
  0xab   :  { %698 = vmatpush3.bf16.msra.mxu0 %v927_v27  ;;  %714 = vmatpush3.bf16.msra.mxu1 %v927_v27 }
  0xac   :  { %719 = vmatprep.subr.bf16.mxu0 %v809_v22  ;;  %735 = vmatprep.subr.bf16.mxu1 %v809_v22 }
  0xae   :  { %700 = vmatmul.mubr.msk.bf16.vlgmr.msra.gmra.mrb[8].mxu0 %vm90_vm3, %v314_v61  ;;  %716 = vmatmul.mubr.msk.bf16.vlgmr.msra.gmra.mrb[8].mxu1 %vm90_vm3, %v370_v62 }
  0xaf   :  { %720 = vmatpush3.bf16.msra.mxu0 %v879_v20  ;;  %736 = vmatpush3.bf16.msra.mxu1 %v879_v20 }
  0xb0   :  { %721 = vmatprep.subr.bf16.mxu0 %v809_v22  ;;  %737 = vmatprep.subr.bf16.mxu1 %v809_v22 }
  0xb1   :  { %731 = vmatprep.mubr.msk.bf16.mxu0 %vm810_vm0, %v809_v22  ;;  %747 = vmatprep.mubr.msk.bf16.mxu1 %vm810_vm0, %v809_v22 }
  0xb3   :  { %722 = vmatpush3.bf16.msra.mxu0 %v887_v23  ;;  %738 = vmatpush3.bf16.msra.mxu1 %v887_v23 }
  0xb4   :  { %723 = vmatprep.subr.bf16.mxu0 %v809_v22  ;;  %739 = vmatprep.subr.bf16.mxu1 %v809_v22 }
  0xb7   :  { %724 = vmatpush3.bf16.msra.mxu0 %v898_v24  ;;  %740 = vmatpush3.bf16.msra.mxu1 %v898_v24 }
  0xb8   :  { %725 = vmatprep.subr.bf16.mxu0 %v809_v22  ;;  %741 = vmatprep.subr.bf16.mxu1 %v809_v22 }
  0xbb   :  { %726 = vmatpush3.bf16.msra.mxu0 %v909_v25  ;;  %742 = vmatpush3.bf16.msra.mxu1 %v909_v25 }
  0xbc   :  { %727 = vmatprep.subr.bf16.mxu0 %v809_v22  ;;  %743 = vmatprep.subr.bf16.mxu1 %v809_v22 }
  0xbf   :  { %728 = vmatpush3.bf16.msra.mxu0 %v918_v26  ;;  %744 = vmatpush3.bf16.msra.mxu1 %v918_v26 }
  0xc0   :  { %729 = vmatprep.subr.bf16.mxu0 %v809_v22  ;;  %745 = vmatprep.subr.bf16.mxu1 %v809_v22 }
  0xc3   :  { %730 = vmatpush3.bf16.msra.mxu0 %v927_v27  ;;  %746 = vmatpush3.bf16.msra.mxu1 %v927_v27 }
  0xc6   :  { %732 = vmatmul.mubr.msk.bf16.vlgmr.msra.gmra.mrb[12].mxu0 %vm90_vm3, %v426_v63  ;;  %748 = vmatmul.mubr.msk.bf16.vlgmr.msra.gmra.mrb[12].mxu1 %vm90_vm3, %v482_v0 }
 0x151   :  { %v128_v2 = vpop.f32.mrb[0].mxu0  ;;  %v184_v3 = vpop.f32.mrb[0].mxu1 }
 0x152   :  { %v129_v4 = vadd.f32 %v545_v1, %v128_v2  ;;  %v185_v5 = vadd.f32 %v545_v1, %v184_v3  ;;  %v637_v6 = vpop.f32.mrb[1].mxu0  ;;  %v653_v7 = vpop.f32.mrb[1].mxu1 }
 0x153   :  { %v131_v8 = vpop.f32.mrb[2].mxu0  ;;  %v187_v9 = vpop.f32.mrb[2].mxu1 }
 0x154   :  { %v134_v10 = vmax.f32 %v129_v4, 0.0  ;;  %v190_v11 = vmax.f32 %v185_v5, 0.0  ;;  %v638_v12 = vpop.f32.mrb[3].mxu0  ;;  %v654_v13 = vpop.f32.mrb[3].mxu1 }
 0x156   :  { %136 = vst.msk [vmem:[#allocation2] sm:$0x3] %vm135_vm4, %v134_v10  ;;  %192 = vst.msk [vmem:[#allocation2 + $0x2] sm:$0x3] %vm135_vm4, %v190_v11 }
 0x169   :  { %v240_v14 = vpop.f32.mrb[4].mxu0  ;;  %v296_v16 = vpop.f32.mrb[4].mxu1 }
 0x16a   :  { %v241_v15 = vadd.f32 %v545_v1, %v240_v14  ;;  %v669_v17 = vpop.f32.mrb[5].mxu0  ;;  %v297_v18 = vadd.f32 %v545_v1, %v296_v16  ;;  %v685_v19 = vpop.f32.mrb[5].mxu1 }
 0x16b   :  { %v243_v20 = vpop.f32.mrb[6].mxu0  ;;  %v299_v22 = vpop.f32.mrb[6].mxu1 }
 0x16c   :  { %v246_v21 = vmax.f32 %v241_v15, 0.0  ;;  %v670_v23 = vpop.f32.mrb[7].mxu0  ;;  %v302_v24 = vmax.f32 %v297_v18, 0.0  ;;  %v686_v25 = vpop.f32.mrb[7].mxu1 }
 0x16e   :  { %248 = vst.msk [vmem:[#allocation2 + $0x4] sm:$0x3] %vm135_vm4, %v246_v21  ;;  %304 = vst.msk [vmem:[#allocation2 + $0x6] sm:$0x3] %vm135_vm4, %v302_v24 }
 0x181   :  { %v352_v26 = vpop.f32.mrb[8].mxu0  ;;  %v408_v28 = vpop.f32.mrb[8].mxu1 }
 0x182   :  { %v353_v27 = vadd.f32 %v545_v1, %v352_v26  ;;  %v701_v29 = vpop.f32.mrb[9].mxu0  ;;  %v409_v30 = vadd.f32 %v545_v1, %v408_v28  ;;  %v717_v31 = vpop.f32.mrb[9].mxu1 }
 0x183   :  { %v355_v32 = vpop.f32.mrb[10].mxu0  ;;  %v411_v34 = vpop.f32.mrb[10].mxu1 }
 0x184   :  { %v358_v33 = vmax.f32 %v353_v27, 0.0  ;;  %v702_v35 = vpop.f32.mrb[11].mxu0  ;;  %v414_v36 = vmax.f32 %v409_v30, 0.0  ;;  %v718_v37 = vpop.f32.mrb[11].mxu1 }
 0x186   :  { %360 = vst.msk [vmem:[#allocation2 + $0x8] sm:$0x3] %vm135_vm4, %v358_v33  ;;  %416 = vst.msk [vmem:[#allocation2 + $0xa] sm:$0x3] %vm135_vm4, %v414_v36 }
 0x199   :  { %v464_v38 = vpop.f32.mrb[12].mxu0  ;;  %v520_v40 = vpop.f32.mrb[12].mxu1 }
 0x19a   :  { %v465_v39 = vadd.f32 %v545_v1, %v464_v38  ;;  %v733_v41 = vpop.f32.mrb[13].mxu0  ;;  %v521_v42 = vadd.f32 %v545_v1, %v520_v40  ;;  %v749_v43 = vpop.f32.mrb[13].mxu1 }
 0x19b   :  { %v467_v44 = vpop.f32.mrb[14].mxu0  ;;  %v523_v46 = vpop.f32.mrb[14].mxu1 }
 0x19c   :  { %v470_v45 = vmax.f32 %v465_v39, 0.0  ;;  %v734_v47 = vpop.f32.mrb[15].mxu0  ;;  %v526_v48 = vmax.f32 %v521_v42, 0.0  ;;  %v750_v49 = vpop.f32.mrb[15].mxu1 }
 0x19e   :  { %472 = vst.msk [vmem:[#allocation2 + $0xc] sm:$0x3] %vm135_vm4, %v470_v45  ;;  %528 = vst.msk [vmem:[#allocation2 + $0xe] sm:$0x3] %vm135_vm4, %v526_v48 }
 0x19f   :  { %794 = shalt.err (!%p791_p4)
}
 0x1a0   :  { %s795_s25 = scalar_lea.hbm %s1094_s4, 256 }
 0x1a1   :  { %p796_p5 = scmp.ne.s32.totalorder %s1094_s4, %s795_s25  ;;  %p799_p6 = scmp.lt.u32.totalorder %s795_s25, %s1094_s4 }
 0x1a3   :  { %p801_p7 = pnand %p799_p6, %p796_p5 }
 0x1a5   :  { %804 = shalt.err (!%p801_p7)
}
 0x1a6   :  { %s812_s29 = smov 2  }
 0x1a7   :  { %540 = dma.vmem_to_hbm [thread:$0]  %s535_s21, 256, %s1094_s4, [#allocation3], %s807_s19, %s807_s19, %s812_s29  }
 0x1a8   :  { %805 = dma.done.wait [#allocation3], 256  }
 0x1a9   :  { %806 = vsyncadd [#allocation3], 4294967040 }
 0x1aa   :  { %544 = vsyncpa [#allocation3], 1 }

</bundles_post_ra>
